<compile_context>
chip_gen: v7x
topology: tpu7x:2x2x1
jax: 0.10.0
libtpu: 0.0.40
codegen_flags: <defaults>
</compile_context>

<pallas_src>
import jax
import jax.numpy as jnp
from jax import lax
from jax.experimental import pallas as pl
from jax.experimental.pallas import tpu as pltpu


def _embedding_kernel(ids_ref, emb_ref, out_ref, iota_ref):
    """One grid step: gather `tile` table rows via a one-hot MXU matmul.

    ids_ref  : VMEM int32 [tile, 1]   flat class indices for this tile
    emb_ref  : VMEM f32   [V, D]      full embedding table (resident every step)
    out_ref  : VMEM f32   [tile, D]   output tile
    iota_ref : VMEM int32 [tile, V]   scratch holding the loop-invariant column iota
    """
    v = emb_ref.shape[0]

    # Loop-invariant iota: generate once, reuse every grid step.
    @pl.when(pl.program_id(0) == 0)
    def _():
        iota_ref[...] = lax.broadcasted_iota(jnp.int32, iota_ref.shape, 1)

    # Clamp: Pallas does no VMEM bounds checks and the final (partial) block's tail
    # ids may be garbage, so keep every id inside the table.  (PyTorch would raise
    # on a genuinely out-of-range id; here it is silently clamped.)
    ids = jnp.clip(ids_ref[...], 0, v - 1)                     # (tile, 1)
    one_hot = (iota_ref[...] == ids).astype(emb_ref.dtype)     # (tile, V), exact 0/1

    # HIGHEST precision => bit-exact gather (one exact 1.0*row term, exact zeros).
    # TODO(synk): for large V (>~1-4K) and/or v5e, switch to a bf16 table or a
    # scalar-prefetch DMA row-gather instead of a HIGHEST-precision f32 matmul.
    out_ref[...] = jnp.dot(
        one_hot, emb_ref[...],
        preferred_element_type=jnp.float32,
        precision=lax.Precision.HIGHEST,
    ).astype(out_ref.dtype)


def class_encoder_forward(x: jax.Array, emb_table: jax.Array,
                          *, vmem_budget_bytes: int = 12 * 1024 * 1024) -> jax.Array:
    """Pallas equivalent of ClassEncoder.forward: emb_table[x].

    x         : integer class indices, arbitrary shape.
    emb_table : [num_classes + 1, emb_dim] float32.
    returns   : x.shape + (emb_dim,) float32.
    """
    orig_shape = x.shape
    flat = x.reshape(-1).astype(jnp.int32)
    n = flat.shape[0]
    v, d = emb_table.shape

    # Size the row tile in bytes: double-buffered output + ids + iota scratch +
    # one-hot temporaries, after reserving the (double-buffered) resident table.
    # TODO(synk): for large V*D on v7x (64 MiB VMEM) single-buffer the constant-index
    # table (pl.Buffered(1)) or tile the emb dim; for huge vocabularies switch to a
    # scalar-prefetch-driven DMA row gather whose VMEM footprint is V-independent.
    table_bytes = 2 * v * d * 4
    bytes_per_row = (2 * d + 3 * v) * 4 + 8
    avail = max(vmem_budget_bytes - table_bytes, 1 << 20)
    tile = max(8, min(1024, (avail // bytes_per_row) // 8 * 8))
    tile = min(tile, pl.cdiv(n, 8) * 8)          # never (much) bigger than n
    num_tiles = pl.cdiv(n, tile)                 # grid need NOT divide n: OOB rows of
                                                 # the last output block are masked on
                                                 # store; the clamp covers its tail ids.
    ids2d = flat.reshape(n, 1)

    vmem_limit = int(min(32 << 20,
                         max(16 << 20, table_bytes + tile * bytes_per_row + (2 << 20))))

    out = pl.pallas_call(
        _embedding_kernel,
        out_shape=jax.ShapeDtypeStruct((n, d), emb_table.dtype),
        grid_spec=pltpu.PrefetchScalarGridSpec(
            num_scalar_prefetch=0,
            grid=(num_tiles,),
            in_specs=[
                # Per-tile ids block in VMEM (feeds the vectorized one-hot build).
                pl.BlockSpec((tile, 1), lambda i: (i, 0)),
                # Full table resident in VMEM every step (constant index_map).
                pl.BlockSpec((v, d), lambda i: (0, 0)),
            ],
            # Block dims equal to the full array dims are legal even when d is not a
            # multiple of 128, so no pad-to-128 + wrapper-slice HBM passes are needed.
            out_specs=pl.BlockSpec((tile, d), lambda i: (i, 0)),
            scratch_shapes=[pltpu.VMEM((tile, v), jnp.int32)],
        ),
        compiler_params=pltpu.CompilerParams(
            dimension_semantics=("parallel",),   # disjoint output tiles
            vmem_limit_bytes=vmem_limit,
        ),
    )(ids2d, emb_table)

    return out.reshape(*orig_shape, d)


def make_class_encoder_params(num_classes: int, emb_dim: int, key) -> jax.Array:
    """Deterministic init matching nn.Embedding default: N(0, 1)."""
    return jax.random.normal(key, (num_classes + 1, emb_dim), dtype=jnp.float32)


if __name__ == "__main__":
    key = jax.random.PRNGKey(0)
    k_emb, k_emb2, k_idx = jax.random.split(key, 3)

    num_classes = 10
    B, S = 2, 8
    x = jax.random.randint(k_idx, (B, S), minval=0, maxval=num_classes + 1, dtype=jnp.int32)

    # Case 1: lane-dense embedding dim (multiple of 128) -> unmasked full-lane stores.
    emb_dim = 128
    emb_table = make_class_encoder_params(num_classes, emb_dim, k_emb)
    y = jax.block_until_ready(class_encoder_forward(x, emb_table))
    y_ref = emb_table[x]
    assert y.shape == (B, S, emb_dim), y.shape
    assert jnp.allclose(y, y_ref, rtol=1e-6, atol=1e-6), "mismatch vs reference (D=128)"

    # Case 2: embedding dim NOT a multiple of 128 -> full-array-dim block, masked vst,
    # still zero pad/slice HBM passes in the wrapper.
    emb_dim2 = 96
    emb_table2 = make_class_encoder_params(num_classes, emb_dim2, k_emb2)
    y2 = jax.block_until_ready(class_encoder_forward(x, emb_table2))
    y2_ref = emb_table2[x]
    assert y2.shape == (B, S, emb_dim2), y2.shape
    assert jnp.allclose(y2, y2_ref, rtol=1e-6, atol=1e-6), "mismatch vs reference (D=96)"

    print("KERNEL_OK")
</pallas_src>

<mosaic_0001>
module attributes {stable_mosaic.version = 11 : i64} {
  func.func @_embedding_kernel(%arg0: i32, %arg1: memref<16x1xi32, #tpu.memory_space<vmem>>, %arg2: memref<11x128xf32, #tpu.memory_space<vmem>>, %arg3: memref<16x128xf32, #tpu.memory_space<vmem>>, %arg4: memref<16x11xi32, #tpu.memory_space<vmem>>) attributes {dimension_semantics = [#tpu.dimension_semantics<parallel>], iteration_bounds = array<i64: 1>, scalar_prefetch = 0 : i64, scratch_operands = 1 : i64, tpu.core_type = #tpu.core_type<tc>, window_params = [{transform_indices = @transform_0, window_bounds = array<i64: 16, 1>}, {pipeline_mode = #tpu.pipeline_mode<synchronous>, transform_indices = @transform_1, window_bounds = array<i64: 11, 128>}, {transform_indices = @transform_2, window_bounds = array<i64: 16, 128>}]} {
    %c0_i32 = arith.constant 0 : i32
    %0 = arith.cmpi eq, %arg0, %c0_i32 : i32
    %1 = arith.extui %0 : i1 to i32
    %c0_i32_0 = arith.constant 0 : i32
    %2 = arith.cmpi ne, %1, %c0_i32_0 : i32
    scf.if %2 {
      %16 = tpu.iota {dimensions = array<i32: 1>} : vector<16x11xi32>
      %c0_9 = arith.constant 0 : index
      %c0_10 = arith.constant 0 : index
      %17 = vector.load %arg4[%c0_9, %c0_10] : memref<16x11xi32, #tpu.memory_space<vmem>>, vector<16x11xi32>
      tpu.vector_store %arg4[%c0_9, %c0_10], %16 {strides = array<i32>} : memref<16x11xi32, #tpu.memory_space<vmem>>, vector<16x11xi32>,
    } else {
    }
    %c0 = arith.constant 0 : index
    %c0_1 = arith.constant 0 : index
    %3 = vector.load %arg1[%c0, %c0_1] : memref<16x1xi32, #tpu.memory_space<vmem>>, vector<16x1xi32>
    %c0_i32_2 = arith.constant 0 : i32
    %c10_i32 = arith.constant 10 : i32
    %4 = vector.broadcast %c0_i32_2 : i32 to vector<16x1xi32>
    %5 = arith.maxsi %4, %3 : vector<16x1xi32>
    %6 = vector.broadcast %c10_i32 : i32 to vector<16x1xi32>
    %7 = arith.minsi %6, %5 : vector<16x1xi32>
    %c0_3 = arith.constant 0 : index
    %c0_4 = arith.constant 0 : index
    %8 = vector.load %arg4[%c0_3, %c0_4] : memref<16x11xi32, #tpu.memory_space<vmem>>, vector<16x11xi32>
    %9 = vector.broadcast %7 : vector<16x1xi32> to vector<16x11xi32>
    %10 = arith.cmpi eq, %8, %9 : vector<16x11xi32>
    %11 = arith.extui %10 : vector<16x11xi1> to vector<16x11xi32>
    %12 = arith.sitofp %11 : vector<16x11xi32> to vector<16x11xf32>
    %c0_5 = arith.constant 0 : index
    %c0_6 = arith.constant 0 : index
    %13 = vector.load %arg2[%c0_5, %c0_6] : memref<11x128xf32, #tpu.memory_space<vmem>>, vector<11x128xf32>
    %cst = arith.constant dense<0.000000e+00> : vector<16x128xf32>
    %14 = tpu.matmul %12, %13, %cst {dimension_numbers = #tpu.dot_dimension_numbers<[1], [0], [0], [1], [0, 0, 1, 1], [], []>, precision = #tpu.contract_precision<fp32>} : vector<16x11xf32>, vector<11x128xf32>, vector<16x128xf32> -> vector<16x128xf32>
    %c0_7 = arith.constant 0 : index
    %c0_8 = arith.constant 0 : index
    %15 = vector.load %arg3[%c0_7, %c0_8] : memref<16x128xf32, #tpu.memory_space<vmem>>, vector<16x128xf32>
    tpu.vector_store %arg3[%c0_7, %c0_8], %14 {strides = array<i32>} : memref<16x128xf32, #tpu.memory_space<vmem>>, vector<16x128xf32>,
    return
  }
  func.func @transform_0(%arg0: i32) -> (i32, i32) {
    %c0_i32 = arith.constant 0 : i32
    %c0_i32_0 = arith.constant 0 : i32
    return %arg0, %c0_i32 : i32, i32
  }
  func.func @transform_1(%arg0: i32) -> (i32, i32) {
    %c0_i32 = arith.constant 0 : i32
    %c0_i32_0 = arith.constant 0 : i32
    %c0_i32_1 = arith.constant 0 : i32
    return %c0_i32, %c0_i32_0 : i32, i32
  }
  func.func @transform_2(%arg0: i32) -> (i32, i32) {
    %c0_i32 = arith.constant 0 : i32
    %c0_i32_0 = arith.constant 0 : i32
    return %arg0, %c0_i32 : i32, i32
  }
}

</mosaic_0001>

<bundles_post_ra>
// kernel: tpu_custom_call.1
= control target key start
LH: loop header
LB: loop body
LE: loop exit
PB: predicated region body
PF: predicated region fallthrough
CT: control target
= control target key end

     0   :  { %v16_v2 = vlaneseq  ;;  %v716_v3 = vmov 0   ;;  %vm18_vm2 = vcmask 89088   ;;  %s770_s0 = inlined_call_operand.vmem [shape: s32[16,1], index: 0, kind: input, shape index: {}]   ;;  %s771_s1 = inlined_call_operand.vmem [shape: f32[11,128], index: 1, kind: input, shape index: {}]   ;;  %s772_s2 = inlined_call_operand.hbm [shape: f32[16,128], index: 2, kind: output, shape index: {}]  }
   0x1   :  { %v21_v0 = vld [vmem:[%s770_s0] sm:$0xff]  ;;  %v22_v1 = vld [vmem:[%s770_s0 + $0x8] sm:$0xff]  ;;  %691 = vset.pattern.permute.xlu0 %v716_v3 }
   0x2   :  { %vm23_vm0 = vcmp.gt.s32.totalorder %v21_v0, 0  ;;  %vm25_vm1 = vcmp.gt.s32.totalorder %v22_v1, 0 }
   0x3   :  { %7 = vsyncpa [#allocation4], 0  ;;  %v24_v4 = vsel %vm23_vm0, %v21_v0, 0  ;;  %v26_v5 = vsel %vm25_vm1, %v22_v1, 0  ;;  %v17_v6 = vand.u32 127, %v16_v2  ;;  %vm54_vm5 = vcmask 1042432  }
   0x4   :  { %vm27_vm3 = vcmp.lt.s32.totalorder %v24_v4, 10  ;;  %vm29_vm4 = vcmp.lt.s32.totalorder %v26_v5, 10  ;;  %v46_v9 = vld [vmem:[%s771_s1 + $0x8] sm:$0x7]  ;;  %v45_v10 = vld [vmem:[%s771_s1] sm:$0xff]  ;;  %v717_v28 = vmov 0.0  }
   0x5   :  { %v28_v7 = vsel %vm27_vm3, %v24_v4, 10  ;;  %19 = vst.msk [vmem:[#allocation2] sm:$0xff] %vm18_vm2, %v17_v6  ;;  %20 = vst.msk [vmem:[#allocation2 + $0x8] sm:$0xff] %vm18_vm2, %v17_v6  ;;  %v30_v8 = vsel %vm29_vm4, %v26_v5, 10  ;;  %v56_v11 = vsel %vm54_vm5, %v46_v9, 0  ;;  %v59_v12 = vand.u32 4294901760, %v45_v10 }
   0x6   :  { %34 = vperm.xlu0 %691, %v28_v7   ;;  %v62_v13 = vand.u32 4294901760, %v56_v11  ;;  %s718_s1 = smov [#allocation3]  }
   0x7   :  { %v147_v15 = vsub.f32 %v45_v10, %v59_v12  ;;  %s567_s16 = sshll.u32 %s718_s1, 4  ;;  %s568_s16 = int_to_ptr.vmem [resolvable:$true] %s567_s16 }
   0x8   :  { %v652_v14 = vpack.c.bf16 %v62_v13, %v59_v12  ;;  %v154_v16 = vsub.f32 %v56_v11, %v62_v13  ;;  %s692_s17 = scalar_lea.vmem %s568_s16, 256  ;;  %p697_p1 = scmp.lt.s32.totalorder %s568_s16, %s568_s16 }
   0x9   :  { %v148_v17 = vand.u32 4294901760, %v147_v15  ;;  %p693_p0 = scmp.ne.s32.totalorder %s568_s16, %s692_s17  ;;  %p698_p2 = scmp.lt.s32.totalorder %s692_s17, %s692_s17 }
   0xa   :  { %37 = vperm.xlu0 %691, %v30_v8   ;;  %665 = vmatprep.subr.bf16.mxu0 %v652_v14  ;;  %v155_v18 = vand.u32 4294901760, %v154_v16  ;;  %v660_v25 = vpack.c.bf16 %v154_v16, %v147_v15 }
   0xb   :  { %653 = vmatprep.subr.bf16.mxu1 %v652_v14  ;;  %667 = vmatpush3.bf16.msra.mxu0 %v652_v14  ;;  %v149_v19 = vsub.f32 %v147_v15, %v148_v17  ;;  %p699_p3 = por %p698_p2, %p697_p1 }
   0xc   :  { %655 = vmatpush3.bf16.msra.mxu1 %v652_v14  ;;  %v156_v20 = vsub.f32 %v154_v16, %v155_v18  ;;  %v668_v21 = vpack.c.bf16 %v155_v18, %v148_v17  ;;  %v31_v26 = vld [vmem:[#allocation2] sm:$0xff]  ;;  %v32_v30 = vld [vmem:[#allocation2 + $0x8] sm:$0xff] }
   0xd   :  { %v150_v22 = vand.u32 4294901760, %v149_v19  ;;  %p700_p4 = pnand %p699_p3, %p693_p0 }
   0xe   :  { %v157_v23 = vand.u32 4294901760, %v156_v20  ;;  %669 = vmatprep.subr.bf16.mxu0 %v668_v21 }
  0x10   :  { %v656_v24 = vpack.c.bf16 %v157_v23, %v150_v22 }
  0x12   :  { %657 = vmatprep.subr.bf16.mxu1 %v656_v24 }
  0x85   :  { %v35_v27 = vpop.permute.xlu0 %34 }
  0x86   :  { %vm39_vm6 = vcmp.eq.s32.totalorder %v31_v26, %v35_v27 }
  0x87   :  { %v578_v29 = vsel %vm39_vm6, 1.0, %v717_v28 }
  0x88   :  { %v49_v31 = vsel %vm18_vm2, %v578_v29, 0 }
  0x89   :  { %v126_v32 = vsub.f32 %v49_v31, %v49_v31  ;;  %v38_v33 = vpop.permute.xlu0 %37 }
  0x8a   :  { %vm40_vm7 = vcmp.eq.s32.totalorder %v32_v30, %v38_v33 }
  0x8b   :  { %v579_v34 = vsel %vm40_vm7, 1.0, %v717_v28  ;;  %v127_v35 = vand.u32 4294901760, %v126_v32 }
  0x8c   :  { %v52_v36 = vsel %vm18_vm2, %v579_v34, 0 }
  0x8d   :  { %v136_v37 = vsub.f32 %v52_v36, %v52_v36  ;;  %635 = vmatprep.mubr.f32.mxu0 %v127_v35  ;;  %v128_v38 = vsub.f32 %v126_v32, %v127_v35 }
  0x8f   :  { %v129_v39 = vand.u32 4294901760, %v128_v38  ;;  %v137_v40 = vand.u32 4294901760, %v136_v37 }
  0x91   :  { %614 = vmatprep.mubr.f32.mxu1 %v129_v39  ;;  %636 = vmatmul.mubr.f32.vlgmr.msra.gmra.mrb[0].mxu0 %v137_v40  ;;  %v138_v41 = vsub.f32 %v136_v37, %v137_v40 }
  0x92   :  { %642 = vmatprep.mubr.msk.f32.mxu0 %vm18_vm2, %v578_v29  ;;  %671 = vmatpush3.bf16.msra.mxu0 %v668_v21 }
  0x93   :  { %v139_v42 = vand.u32 4294901760, %v138_v41  ;;  %673 = vmatprep.subr.bf16.mxu0 %v652_v14 }
  0x95   :  { %615 = vmatmul.mubr.f32.vlgmr.msra.gmra.mrb[0].mxu1 %v139_v42 }
  0x96   :  { %659 = vmatpush3.bf16.msra.mxu1 %v656_v24  ;;  %621 = vmatprep.mubr.msk.f32.mxu1 %vm18_vm2, %v578_v29 }
  0x97   :  { %661 = vmatprep.subr.bf16.mxu1 %v660_v25 }
  0x99   :  { %643 = vmatmul.mubr.msk.f32.vlgmr.msra.gmra.mrb[0].mxu0 %vm18_vm2, %v579_v34 }
  0x9a   :  { %649 = vmatprep.mubr.msk.f32.mxu0 %vm18_vm2, %v578_v29  ;;  %675 = vmatpush3.bf16.msra.mxu0 %v652_v14 }
  0x9d   :  { %622 = vmatmul.mubr.msk.f32.vlgmr.msra.gmra.mrb[0].mxu1 %vm18_vm2, %v579_v34 }
  0x9e   :  { %663 = vmatpush3.bf16.msra.mxu1 %v660_v25  ;;  %628 = vmatprep.mubr.f32.mxu1 %v126_v32 }
  0xa1   :  { %650 = vmatmul.mubr.msk.f32.vlgmr.msra.gmra.mrb[0].mxu0 %vm18_vm2, %v579_v34 }
  0xa5   :  { %629 = vmatmul.mubr.f32.vlgmr.msra.gmra.mrb[0].mxu1 %v136_v37 }
 0x174   :  { %v651_v43 = vpop.f32.mrb[0].mxu0 }
 0x175   :  { %v550_v44 = vpop.f32.mrb[1].mxu0 }
 0x178   :  { %v630_v45 = vpop.f32.mrb[0].mxu1 }
 0x179   :  { %v676_v46 = vadd.f32 %v651_v43, %v630_v45  ;;  %v304_v47 = vpop.f32.mrb[1].mxu1 }
 0x17a   :  { %v677_v48 = vadd.f32 %v550_v44, %v304_v47 }
 0x17b   :  { %561 = vst [vmem:[#allocation3 + $0x8] sm:$0xff] %v676_v46 }
 0x17c   :  { %560 = vst [vmem:[#allocation3] sm:$0xff] %v677_v48 }
 0x17d   :  { %703 = shalt.err (!%p700_p4)
}
 0x17e   :  { %s704_s20 = scalar_lea.hbm %s772_s2, 256 }
 0x17f   :  { %p705_p5 = scmp.ne.s32.totalorder %s772_s2, %s704_s20  ;;  %p708_p6 = scmp.lt.u32.totalorder %s704_s20, %s772_s2 }
 0x181   :  { %p710_p7 = pnand %p708_p6, %p705_p5 }
 0x183   :  { %713 = shalt.err (!%p710_p7)
}
 0x184   :  { %s719_s25 = smov 128   ;;  %s720_s26 = smov 8  }
 0x185   :  { %573 = dma.vmem_to_hbm [thread:$0]  %s568_s16, 256, %s772_s2, [#allocation4], %s719_s25, %s719_s25, %s720_s26  }
 0x186   :  { %714 = dma.done.wait [#allocation4], 256  }
 0x187   :  { %715 = vsyncadd [#allocation4], 4294967040 }
 0x188   :  { %577 = vsyncpa [#allocation4], 1 }

</bundles_post_ra>
